<compile_context>
chip_gen: v6e
topology: v6e:2x2x1
jax: 0.10.0
libtpu: 0.0.40
codegen_flags: <defaults>
</compile_context>

<pallas_src>
import jax
import jax.numpy as jnp
import numpy as np
from jax.experimental import pallas as pl
from jax.experimental.pallas import tpu as pltpu


def _round_up(x, m):
    return ((x + m - 1) // m) * m


# ----------------------------- Pallas kernels ------------------------------ #

def conv1d_kernel(x_ref, w_ref, b_ref, y_ref):
    """Im2col Conv1D: one MXU matmul per time block.

    x_ref : (t_blk, B, K)   im2col input block, K = L*C (taps packed along lanes)
    w_ref : (K, F)          flattened filter (row k*C + c == W[:, c, k])
    b_ref : (1, F)
    y_ref : (t_blk, B, F)
    """
    t, b, k = x_ref.shape
    f = y_ref.shape[-1]
    xf = x_ref[...].reshape(t * b, k)
    y = jnp.dot(xf, w_ref[...], preferred_element_type=jnp.float32) + b_ref[...]
    y_ref[...] = y.reshape(t, b, f)


def gru_layer_kernel(x_ref, wih_ref, bih_ref, whh_ref, bhn_ref,
                     out_ref, gi_ref, h_ref):
    """One GRU layer over one time chunk: fused input projection + recurrence.

    x_ref   : (t_blk, B, Din)  layer input chunk (time-major)
    wih_ref : (Din, 3H)        [W_ir | W_iz | W_in]^T, lane-aligned gate blocks
    bih_ref : (1, 3H)          [b_ir+b_hr | b_iz+b_hz | b_in]
    whh_ref : (H, 3H)          [W_hr | W_hz | W_hn]^T
    bhn_ref : (1, H)           b_hn (stays inside r * (.), PyTorch semantics)
    out_ref : (t_blk, B, H)    hidden states for this chunk
    gi_ref  : (t_blk, B, 3H)   VMEM scratch for the precomputed input gates
    h_ref   : (B, H)           VMEM scratch carrying h across time chunks
    """
    T, B, Din = x_ref.shape
    H = out_ref.shape[-1]

    @pl.when(pl.program_id(0) == 0)
    def _():
        h_ref[...] = jnp.zeros_like(h_ref)

    # Chunk-local input projection: one big MXU matmul for all 3 gates.
    xf = x_ref[...].reshape(T * B, Din)
    gi_ref[...] = (jnp.dot(xf, wih_ref[...], preferred_element_type=jnp.float32)
                   + bih_ref[...]).reshape(T, B, 3 * H)

    # Hoisted out of the serial loop: hidden weights + b_hn broadcast.
    whh = whh_ref[...]
    bhn = jnp.broadcast_to(bhn_ref[...], (B, H))

    def step(t, h):
        gh = jnp.dot(h, whh, preferred_element_type=jnp.float32)     # (B, 3H)
        gi = gi_ref[t]                                               # (B, 3H)
        r = jax.nn.sigmoid(gi[:, 0:H] + gh[:, 0:H])
        z = jax.nn.sigmoid(gi[:, H:2 * H] + gh[:, H:2 * H])
        n = jnp.tanh(gi[:, 2 * H:] + r * (gh[:, 2 * H:] + bhn))
        h_new = (1.0 - z) * n + z * h
        out_ref[t] = h_new
        return h_new

    h_ref[...] = jax.lax.fori_loop(0, T, step, h_ref[...], unroll=4)


# -------------------------- parameter preparation --------------------------- #

def _prep_gru_layer(layer, din_pad, h_pad):
    """PyTorch GRU weights -> transposed, padded, lane-concatenated gate tensors."""
    w_ih, w_hh = layer['w_ih'], layer['w_hh']         # (3H, Din), (3H, H)
    b_ih, b_hh = layer['b_ih'], layer['b_hh']         # (3H,), (3H,)
    H = w_hh.shape[1]

    def padw(a, rows, cols):
        return jnp.pad(a, ((0, rows - a.shape[0]), (0, cols - a.shape[1])))

    def padb(v, n):
        return jnp.pad(v, (0, n - v.shape[0]))

    wih_cat = jnp.concatenate(
        [padw(w_ih[g * H:(g + 1) * H].T, din_pad, h_pad) for g in range(3)], axis=1)
    whh_cat = jnp.concatenate(
        [padw(w_hh[g * H:(g + 1) * H].T, h_pad, h_pad) for g in range(3)], axis=1)
    # Fold r/z input+hidden biases and b_in into the input projection; keep b_hn
    # separate because PyTorch computes n = tanh(gi_n + r * (W_hn h + b_hn)).
    bih_cat = jnp.concatenate(
        [padb(b_ih[0:H] + b_hh[0:H], h_pad),
         padb(b_ih[H:2 * H] + b_hh[H:2 * H], h_pad),
         padb(b_ih[2 * H:3 * H], h_pad)]).reshape(1, 3 * h_pad)
    b_hn = padb(b_hh[2 * H:3 * H], h_pad).reshape(1, h_pad)
    return wih_cat, whh_cat, bih_cat, b_hn


# ------------------------------ JAX wrapper -------------------------------- #

def speech_encoder_bottom_forward(x, params, *, stride=2):
    """x: (B, T, size_vocab) float32, batch_first like the PyTorch module."""
    B, T, C = x.shape
    Wc, bc = params['conv']['w'], params['conv']['b']   # (F, C, L), (F,)
    F_, _, L = Wc.shape
    Tp = (T - L) // stride + 1

    B_pad = _round_up(B, 8)
    F_pad = _round_up(F_, 128)
    K = L * C
    K_pad = _round_up(K, 128)

    # Shared time block / chunk size; pad Tp up to a multiple so every grid block
    # is full (padded steps come after the real ones and are sliced away).
    t_blk = min(Tp, 256)
    T_pad = _round_up(Tp, t_blk)
    n_blk = T_pad // t_blk

    # im2col layout: x_cols[t, b, k*C + c] = x[b, stride*t + k, c]
    x_tm = jnp.transpose(x, (1, 0, 2))                                   # (T, B, C)
    taps = [x_tm[k:k + stride * (Tp - 1) + 1:stride] for k in range(L)]  # (Tp,B,C)
    x_cols = jnp.concatenate(taps, axis=-1)                              # (Tp,B,L*C)
    x_cols = jnp.pad(x_cols, ((0, T_pad - Tp), (0, B_pad - B), (0, K_pad - K)))

    w_flat = jnp.concatenate([Wc[:, :, k].T for k in range(L)], axis=0)  # (L*C, F)
    w_flat = jnp.pad(w_flat, ((0, K_pad - K), (0, F_pad - F_)))
    b_conv = jnp.pad(bc, (0, F_pad - F_)).reshape(1, F_pad)

    y = pl.pallas_call(
        conv1d_kernel,
        out_shape=jax.ShapeDtypeStruct((T_pad, B_pad, F_pad), jnp.float32),
        grid=(n_blk,),
        in_specs=[pl.BlockSpec((t_blk, B_pad, K_pad), lambda i: (i, 0, 0)),
                  pl.BlockSpec((K_pad, F_pad), lambda i: (0, 0)),
                  pl.BlockSpec((1, F_pad), lambda i: (0, 0))],
        out_specs=pl.BlockSpec((t_blk, B_pad, F_pad), lambda i: (i, 0, 0)),
        compiler_params=pltpu.CompilerParams(
            dimension_semantics=("parallel",)),
    )(x_cols, w_flat, b_conv)

    # Dropout(p=0.0) is the identity.
    seq = y                                     # (T_pad, B_pad, F_pad), time-major
    din_pad = F_pad
    for layer in params['gru']:
        H = layer['w_hh'].shape[1]
        h_pad = _round_up(H, 128)
        wih_cat, whh_cat, bih_cat, b_hn = _prep_gru_layer(layer, din_pad, h_pad)

        seq = pl.pallas_call(
            gru_layer_kernel,
            out_shape=jax.ShapeDtypeStruct((T_pad, B_pad, h_pad), jnp.float32),
            grid=(n_blk,),
            in_specs=[pl.BlockSpec((t_blk, B_pad, din_pad), lambda c: (c, 0, 0)),
                      pl.BlockSpec((din_pad, 3 * h_pad), lambda c: (0, 0)),
                      pl.BlockSpec((1, 3 * h_pad), lambda c: (0, 0)),
                      pl.BlockSpec((h_pad, 3 * h_pad), lambda c: (0, 0)),
                      pl.BlockSpec((1, h_pad), lambda c: (0, 0))],
            out_specs=pl.BlockSpec((t_blk, B_pad, h_pad), lambda c: (c, 0, 0)),
            scratch_shapes=[pltpu.VMEM((t_blk, B_pad, 3 * h_pad), jnp.float32),
                            pltpu.VMEM((B_pad, h_pad), jnp.float32)],
            compiler_params=pltpu.CompilerParams(
                dimension_semantics=("arbitrary",)),
        )(seq, wih_cat, bih_cat, whh_cat, b_hn)
        din_pad = h_pad

    out_bm = jnp.transpose(seq, (1, 0, 2))      # (B_pad, T_pad, D_pad)
    if params['gru']:
        H_last = params['gru'][-1]['w_hh'].shape[1]
        return out_bm[:B, :Tp, :H_last]
    return out_bm[:B, :Tp, :F_]                 # depth == 0: conv output


# --------------------------- pure-JAX reference ----------------------------- #

def reference_forward(x, params, *, stride=2):
    Wc, bc = params['conv']['w'], params['conv']['b']
    F_, C, L = Wc.shape
    B, T, _ = x.shape
    Tp = (T - L) // stride + 1
    y = jnp.zeros((B, Tp, F_), jnp.float32) + bc
    for k in range(L):
        xk = x[:, k:k + stride * (Tp - 1) + 1:stride, :]
        y = y + jnp.einsum('btc,fc->btf', xk, Wc[:, :, k])

    h = y
    for layer in params['gru']:
        w_ih, w_hh = layer['w_ih'], layer['w_hh']
        b_ih, b_hh = layer['b_ih'], layer['b_hh']
        H = w_hh.shape[1]

        def step(hs, x_t, w_ih=w_ih, w_hh=w_hh, b_ih=b_ih, b_hh=b_hh, H=H):
            gi = x_t @ w_ih.T + b_ih
            gh = hs @ w_hh.T + b_hh
            r = jax.nn.sigmoid(gi[:, :H] + gh[:, :H])
            z = jax.nn.sigmoid(gi[:, H:2 * H] + gh[:, H:2 * H])
            n = jnp.tanh(gi[:, 2 * H:] + r * gh[:, 2 * H:])
            hn = (1.0 - z) * n + z * hs
            return hn, hn

        _, outs = jax.lax.scan(step, jnp.zeros((B, H), jnp.float32),
                               jnp.transpose(h, (1, 0, 2)))
        h = jnp.transpose(outs, (1, 0, 2))
    return h


# ------------------------------ param init ---------------------------------- #

def init_params(key, size_vocab, size, depth, filter_length, filter_size):
    scale = 0.1
    key, k1, k2 = jax.random.split(key, 3)
    params = {
        'conv': {
            'w': scale * jax.random.normal(
                k1, (filter_size, size_vocab, filter_length), jnp.float32),
            'b': scale * jax.random.normal(k2, (filter_size,), jnp.float32),
        },
        'gru': [],
    }
    for l in range(depth):
        din = filter_size if l == 0 else size
        key, k1, k2, k3, k4 = jax.random.split(key, 5)
        params['gru'].append({
            'w_ih': scale * jax.random.normal(k1, (3 * size, din), jnp.float32),
            'w_hh': scale * jax.random.normal(k2, (3 * size, size), jnp.float32),
            'b_ih': scale * jax.random.normal(k3, (3 * size,), jnp.float32),
            'b_hh': scale * jax.random.normal(k4, (3 * size,), jnp.float32),
        })
    return params


# ---------------------------------- main ------------------------------------ #

if __name__ == "__main__":
    B, T = 2, 20
    size_vocab, size, depth = 13, 32, 2
    filter_length, filter_size, stride = 6, 64, 2

    key = jax.random.PRNGKey(0)
    key, kx = jax.random.split(key)
    x = jax.random.normal(kx, (B, T, size_vocab), jnp.float32)
    params = init_params(key, size_vocab, size, depth, filter_length, filter_size)

    out = speech_encoder_bottom_forward(x, params, stride=stride)
    out = jax.block_until_ready(out)

    ref = jax.block_until_ready(reference_forward(x, params, stride=stride))
    Tp = (T - filter_length) // stride + 1
    assert out.shape == (B, Tp, size)
    np.testing.assert_allclose(np.asarray(out), np.asarray(ref),
                               rtol=1e-4, atol=1e-5)

    print("KERNEL_OK")
</pallas_src>

<mosaic_0001>
module attributes {stable_mosaic.version = 11 : i64} {
  func.func @conv1d_kernel(%arg0: i32, %arg1: memref<8x8x128xf32, #tpu.memory_space<vmem>>, %arg2: memref<128x128xf32, #tpu.memory_space<vmem>>, %arg3: memref<1x128xf32, #tpu.memory_space<vmem>>, %arg4: memref<8x8x128xf32, #tpu.memory_space<vmem>>) attributes {dimension_semantics = [#tpu.dimension_semantics<parallel>], iteration_bounds = array<i64: 1>, scalar_prefetch = 0 : i64, scratch_operands = 0 : i64, tpu.core_type = #tpu.core_type<tc>, window_params = [{transform_indices = @transform_0, window_bounds = array<i64: 8, 8, 128>}, {pipeline_mode = #tpu.pipeline_mode<synchronous>, transform_indices = @transform_1, window_bounds = array<i64: 128, 128>}, {pipeline_mode = #tpu.pipeline_mode<synchronous>, transform_indices = @transform_2, window_bounds = array<i64: 1, 128>}, {transform_indices = @transform_3, window_bounds = array<i64: 8, 8, 128>}]} {
    %c0 = arith.constant 0 : index
    %c0_0 = arith.constant 0 : index
    %c0_1 = arith.constant 0 : index
    %0 = vector.load %arg1[%c0, %c0_0, %c0_1] : memref<8x8x128xf32, #tpu.memory_space<vmem>>, vector<8x8x128xf32>
    %1 = vector.shape_cast %0 : vector<8x8x128xf32> to vector<64x128xf32>
    %c0_2 = arith.constant 0 : index
    %c0_3 = arith.constant 0 : index
    %2 = vector.load %arg2[%c0_2, %c0_3] : memref<128x128xf32, #tpu.memory_space<vmem>>, vector<128x128xf32>
    %cst = arith.constant dense<0.000000e+00> : vector<64x128xf32>
    %3 = tpu.matmul %1, %2, %cst {dimension_numbers = #tpu.dot_dimension_numbers<[1], [0], [0], [1], [0, 0, 1, 1], [], []>} : vector<64x128xf32>, vector<128x128xf32>, vector<64x128xf32> -> vector<64x128xf32>
    %c0_4 = arith.constant 0 : index
    %c0_5 = arith.constant 0 : index
    %4 = vector.load %arg3[%c0_4, %c0_5] : memref<1x128xf32, #tpu.memory_space<vmem>>, vector<1x128xf32>
    %5 = vector.broadcast %4 : vector<1x128xf32> to vector<64x128xf32>
    %6 = arith.addf %3, %5 : vector<64x128xf32>
    %7 = vector.shape_cast %6 : vector<64x128xf32> to vector<8x8x128xf32>
    %c0_6 = arith.constant 0 : index
    %c0_7 = arith.constant 0 : index
    %c0_8 = arith.constant 0 : index
    %8 = vector.load %arg4[%c0_6, %c0_7, %c0_8] : memref<8x8x128xf32, #tpu.memory_space<vmem>>, vector<8x8x128xf32>
    tpu.vector_store %arg4[%c0_6, %c0_7, %c0_8], %7 {strides = array<i32>} : memref<8x8x128xf32, #tpu.memory_space<vmem>>, vector<8x8x128xf32>,
    return
  }
  func.func @transform_0(%arg0: i32) -> (i32, i32, i32) {
    %c0_i32 = arith.constant 0 : i32
    %c0_i32_0 = arith.constant 0 : i32
    %c0_i32_1 = arith.constant 0 : i32
    return %arg0, %c0_i32, %c0_i32_0 : i32, i32, i32
  }
  func.func @transform_1(%arg0: i32) -> (i32, i32) {
    %c0_i32 = arith.constant 0 : i32
    %c0_i32_0 = arith.constant 0 : i32
    %c0_i32_1 = arith.constant 0 : i32
    return %c0_i32, %c0_i32_0 : i32, i32
  }
  func.func @transform_2(%arg0: i32) -> (i32, i32) {
    %c0_i32 = arith.constant 0 : i32
    %c0_i32_0 = arith.constant 0 : i32
    %c0_i32_1 = arith.constant 0 : i32
    return %c0_i32, %c0_i32_0 : i32, i32
  }
  func.func @transform_3(%arg0: i32) -> (i32, i32, i32) {
    %c0_i32 = arith.constant 0 : i32
    %c0_i32_0 = arith.constant 0 : i32
    %c0_i32_1 = arith.constant 0 : i32
    return %arg0, %c0_i32, %c0_i32_0 : i32, i32, i32
  }
}

</mosaic_0001>

<bundles_post_ra>
// kernel: tpu_custom_call.1
= control target key start
LH: loop header
LB: loop body
LE: loop exit
PB: predicated region body
PF: predicated region fallthrough
CT: control target
= control target key end

     0   :  { %8 = vsyncpa [#allocation3], 0  ;;  %s423_s0 = inlined_call_operand.hbm [shape: f32[8,8,128], index: 0, kind: input, shape index: {}]   ;;  %s424_s1 = inlined_call_operand.hbm [shape: f32[128,128], index: 1, kind: input, shape index: {}]   ;;  %s425_s2 = inlined_call_operand.vmem [shape: f32[1,128], index: 2, kind: input, shape index: {}]   ;;  %s426_s3 = inlined_call_operand.hbm [shape: f32[8,8,128], index: 3, kind: output, shape index: {}]  }
   0x1   :  { %9 = vsyncpa [#allocation6], 0 }
   0x2   :  { %10 = vsyncpa [#allocation4], 0  ;;  %s377_s12 = smov [#allocation2]  }
   0x3   :  { %s16_s13 = sshll.u32 %s377_s12, 4  ;;  %s17_s13 = int_to_ptr.vmem [resolvable:$true] %s16_s13 }
   0x4   :  { %s319_s14 = scalar_lea.vmem %s17_s13, 1024  ;;  %p324_p1 = scmp.lt.s32.totalorder %s17_s13, %s17_s13 }
   0x5   :  { %p320_p0 = scmp.ne.s32.totalorder %s17_s13, %s319_s14  ;;  %p325_p2 = scmp.lt.s32.totalorder %s319_s14, %s319_s14 }
   0x7   :  { %p326_p3 = por %p325_p2, %p324_p1 }
   0x9   :  { %p327_p4 = pnand %p326_p3, %p320_p0 }
   0xb   :  { %330 = shalt.err (!%p327_p4)
}
   0xc   :  { %s378_s15 = smov 128   ;;  %s379_s16 = smov 8  }
   0xd   :  { %22 = dma.hbm_to_vmem [thread:$0]  %s423_s0, 1024, %s17_s13, [#allocation3], %s378_s15, %s378_s15, %s379_s16  }
   0xe   :  { %s380_s19 = smov [#allocation5]  }
   0xf   :  { %s28_s20 = sshll.u32 %s380_s19, 4  ;;  %s29_s20 = int_to_ptr.vmem [resolvable:$true] %s28_s20 }
  0x10   :  { %s339_s21 = scalar_lea.vmem %s29_s20, 2048  ;;  %p344_p6 = scmp.lt.s32.totalorder %s29_s20, %s29_s20 }
  0x11   :  { %p340_p5 = scmp.ne.s32.totalorder %s29_s20, %s339_s21  ;;  %p345_p7 = scmp.lt.s32.totalorder %s339_s21, %s339_s21 }
  0x13   :  { %p346_p8 = por %p345_p7, %p344_p6 }
  0x15   :  { %p347_p9 = pnand %p346_p8, %p340_p5 }
  0x17   :  { %350 = shalt.err (!%p347_p9)
}
  0x18   :  { %34 = dma.hbm_to_vmem [thread:$0]  %s424_s1, 2048, %s29_s20, [#allocation6], %s378_s15, %s378_s15, %s379_s16  }
  0x19   :  { %371 = dma.done.wait [#allocation3], 1024  }
  0x1a   :  { %372 = vsyncadd [#allocation3], 4294966272 }
  0x1b   :  { %373 = dma.done.wait [#allocation6], 2048  }
  0x1c   :  { %374 = vsyncadd [#allocation6], 4294965248  ;;  %v66_v0 = vld [vmem:[#allocation5 + $0x78] sm:$0xff]  ;;  %v65_v1 = vld [vmem:[#allocation5 + $0x70] sm:$0xff]  ;;  %s381_s24 = smov [#allocation7]  }
  0x1d   :  { %230 = vmatprep.subr.mxu0 %v66_v0  ;;  %274 = vmatprep.subr.mxu1 %v66_v0  ;;  %v64_v2 = vld [vmem:[#allocation5 + $0x68] sm:$0xff]  ;;  %v63_v3 = vld [vmem:[#allocation5 + $0x60] sm:$0xff]  ;;  %v62_v4 = vld [vmem:[#allocation5 + $0x58] sm:$0xff]  ;;  %s192_s25 = sshll.u32 %s381_s24, 4  ;;  %s193_s25 = int_to_ptr.vmem [resolvable:$true] %s192_s25 }
  0x1e   :  { %231 = vmatpush3.msra.mxu0 %v66_v0  ;;  %290 = vmatpush3.msra.mxu1 %v66_v0  ;;  %v61_v5 = vld [vmem:[#allocation5 + $0x50] sm:$0xff]  ;;  %v60_v6 = vld [vmem:[#allocation5 + $0x48] sm:$0xff]  ;;  %v59_v7 = vld [vmem:[#allocation5 + $0x40] sm:$0xff]  ;;  %p356_p11 = scmp.lt.s32.totalorder %s193_s25, %s193_s25 }
  0x1f   :  { %232 = vmatprep.subr.mxu0 %v65_v1  ;;  %275 = vmatprep.subr.mxu1 %v65_v1  ;;  %v58_v8 = vld [vmem:[#allocation5 + $0x38] sm:$0xff]  ;;  %v57_v9 = vld [vmem:[#allocation5 + $0x30] sm:$0xff]  ;;  %v56_v10 = vld [vmem:[#allocation5 + $0x28] sm:$0xff] }
  0x20   :  { %233 = vmatpush3.msra.mxu0 %v65_v1  ;;  %291 = vmatpush3.msra.mxu1 %v65_v1  ;;  %v55_v11 = vld [vmem:[#allocation5 + $0x20] sm:$0xff]  ;;  %v54_v12 = vld [vmem:[#allocation5 + $0x18] sm:$0xff]  ;;  %v53_v13 = vld [vmem:[#allocation5 + $0x10] sm:$0xff] }
  0x21   :  { %234 = vmatprep.subr.mxu0 %v64_v2  ;;  %276 = vmatprep.subr.mxu1 %v64_v2  ;;  %v52_v14 = vld [vmem:[#allocation5 + $0x8] sm:$0xff]  ;;  %v51_v15 = vld [vmem:[#allocation5] sm:$0xff]  ;;  %v45_v20 = vld [vmem:[#allocation2 + $0x10] sm:$0xff] }
  0x22   :  { %235 = vmatpush3.msra.mxu0 %v64_v2  ;;  %292 = vmatpush3.msra.mxu1 %v64_v2  ;;  %v43_v16 = vld [vmem:[#allocation2] sm:$0xff]  ;;  %v44_v18 = vld [vmem:[#allocation2 + $0x8] sm:$0xff]  ;;  %v49_v21 = vld [vmem:[#allocation2 + $0x30] sm:$0xff] }
  0x23   :  { %236 = vmatprep.subr.mxu0 %v63_v3  ;;  %277 = vmatprep.subr.mxu1 %v63_v3  ;;  %v47_v17 = vld [vmem:[#allocation2 + $0x20] sm:$0xff]  ;;  %v48_v19 = vld [vmem:[#allocation2 + $0x28] sm:$0xff]  ;;  %v46_v22 = vld [vmem:[#allocation2 + $0x18] sm:$0xff] }
  0x24   :  { %237 = vmatpush3.msra.mxu0 %v63_v3  ;;  %293 = vmatpush3.msra.mxu1 %v63_v3  ;;  %v50_v23 = vld [vmem:[#allocation2 + $0x38] sm:$0xff]  ;;  %v205_v24 = vld [vmem:[%s425_s2] ss:$0 sm:$0xff]  ;;  %s351_s2 = scalar_lea.vmem %s193_s25, 1024 }
  0x25   :  { %238 = vmatprep.subr.mxu0 %v62_v4  ;;  %278 = vmatprep.subr.mxu1 %v62_v4  ;;  %p352_p10 = scmp.ne.s32.totalorder %s193_s25, %s351_s2  ;;  %p357_p12 = scmp.lt.s32.totalorder %s351_s2, %s351_s2 }
  0x26   :  { %239 = vmatpush3.msra.mxu0 %v62_v4  ;;  %294 = vmatpush3.msra.mxu1 %v62_v4 }
  0x27   :  { %240 = vmatprep.subr.mxu0 %v61_v5  ;;  %279 = vmatprep.subr.mxu1 %v61_v5  ;;  %p358_p13 = por %p357_p12, %p356_p11 }
  0x28   :  { %241 = vmatpush3.msra.mxu0 %v61_v5  ;;  %295 = vmatpush3.msra.mxu1 %v61_v5 }
  0x29   :  { %242 = vmatprep.subr.mxu0 %v60_v6  ;;  %280 = vmatprep.subr.mxu1 %v60_v6  ;;  %p359_p0 = pnand %p358_p13, %p352_p10 }
  0x2a   :  { %243 = vmatpush3.msra.mxu0 %v60_v6  ;;  %296 = vmatpush3.msra.mxu1 %v60_v6 }
  0x2b   :  { %244 = vmatprep.subr.mxu0 %v59_v7  ;;  %281 = vmatprep.subr.mxu1 %v59_v7 }
  0x2c   :  { %245 = vmatpush3.msra.mxu0 %v59_v7  ;;  %297 = vmatpush3.msra.mxu1 %v59_v7 }
  0x2d   :  { %246 = vmatprep.subr.mxu0 %v58_v8  ;;  %282 = vmatprep.subr.mxu1 %v58_v8 }
  0x2e   :  { %247 = vmatpush3.msra.mxu0 %v58_v8  ;;  %298 = vmatpush3.msra.mxu1 %v58_v8 }
  0x2f   :  { %248 = vmatprep.subr.mxu0 %v57_v9  ;;  %283 = vmatprep.subr.mxu1 %v57_v9 }
  0x30   :  { %249 = vmatpush3.msra.mxu0 %v57_v9  ;;  %299 = vmatpush3.msra.mxu1 %v57_v9 }
  0x31   :  { %250 = vmatprep.subr.mxu0 %v56_v10  ;;  %284 = vmatprep.subr.mxu1 %v56_v10 }
  0x32   :  { %251 = vmatpush3.msra.mxu0 %v56_v10  ;;  %300 = vmatpush3.msra.mxu1 %v56_v10 }
  0x33   :  { %252 = vmatprep.subr.mxu0 %v55_v11  ;;  %285 = vmatprep.subr.mxu1 %v55_v11 }
  0x34   :  { %253 = vmatpush3.msra.mxu0 %v55_v11  ;;  %301 = vmatpush3.msra.mxu1 %v55_v11 }
  0x35   :  { %254 = vmatprep.subr.mxu0 %v54_v12  ;;  %286 = vmatprep.subr.mxu1 %v54_v12 }
  0x36   :  { %255 = vmatpush3.msra.mxu0 %v54_v12  ;;  %302 = vmatpush3.msra.mxu1 %v54_v12 }
  0x37   :  { %256 = vmatprep.subr.mxu0 %v53_v13  ;;  %287 = vmatprep.subr.mxu1 %v53_v13 }
  0x38   :  { %257 = vmatpush3.msra.mxu0 %v53_v13  ;;  %303 = vmatpush3.msra.mxu1 %v53_v13 }
  0x39   :  { %258 = vmatprep.subr.mxu0 %v52_v14  ;;  %288 = vmatprep.subr.mxu1 %v52_v14 }
  0x3a   :  { %259 = vmatpush3.msra.mxu0 %v52_v14  ;;  %304 = vmatpush3.msra.mxu1 %v52_v14 }
  0x3b   :  { %260 = vmatprep.subr.mxu0 %v51_v15  ;;  %289 = vmatprep.subr.mxu1 %v51_v15 }
  0x3c   :  { %261 = vmatpush3.msra.mxu0 %v51_v15  ;;  %305 = vmatpush3.msra.mxu1 %v51_v15 }
  0x3d   :  { %262 = vmatprep.mubr.f32.mxu0 %v43_v16  ;;  %268 = vmatprep.mubr.f32.mxu1 %v47_v17 }
  0x3e   :  { %263 = vmatmul.mubr.f32.vlgmr.msra.gmra.mxu0 %v44_v18  ;;  %269 = vmatmul.mubr.f32.vlgmr.msra.gmra.mxu1 %v48_v19 }
  0x3f   :  { %265 = vmatprep.mubr.f32.mxu0 %v45_v20  ;;  %271 = vmatprep.mubr.f32.mxu1 %v49_v21 }
  0x42   :  { %266 = vmatmul.mubr.f32.gmra.mxu0 %v46_v22  ;;  %272 = vmatmul.mubr.f32.gmra.mxu1 %v50_v23 }
  0xfe   :  { %v264_v25 = vpop.f32.mrf.mxu0  ;;  %v270_v26 = vpop.f32.mrf.mxu1 }
  0xff   :  { %v146_v27 = vadd.f32 %v264_v25, %v205_v24  ;;  %v166_v28 = vadd.f32 %v270_v26, %v205_v24 }
 0x100   :  { %v140_v29 = vpop.f32.mrf.mxu0  ;;  %v160_v30 = vpop.f32.mrf.mxu1 }
 0x101   :  { %180 = vst [vmem:[#allocation7 + $0x8] sm:$0xff] %v146_v27  ;;  %184 = vst [vmem:[#allocation7 + $0x28] sm:$0xff] %v166_v28  ;;  %v141_v31 = vadd.f32 %v205_v24, %v140_v29  ;;  %v161_v32 = vadd.f32 %v205_v24, %v160_v30 }
 0x102   :  { %v267_v33 = vpop.f32.mrf.mxu0  ;;  %v273_v34 = vpop.f32.mrf.mxu1 }
 0x103   :  { %179 = vst [vmem:[#allocation7] sm:$0xff] %v141_v31  ;;  %183 = vst [vmem:[#allocation7 + $0x20] sm:$0xff] %v161_v32  ;;  %v156_v35 = vadd.f32 %v267_v33, %v205_v24  ;;  %v176_v36 = vadd.f32 %v273_v34, %v205_v24 }
 0x104   :  { %v150_v37 = vpop.f32.mrf.mxu0  ;;  %v170_v38 = vpop.f32.mrf.mxu1 }
 0x105   :  { %182 = vst [vmem:[#allocation7 + $0x18] sm:$0xff] %v156_v35  ;;  %186 = vst [vmem:[#allocation7 + $0x38] sm:$0xff] %v176_v36  ;;  %v151_v39 = vadd.f32 %v205_v24, %v150_v37  ;;  %v171_v40 = vadd.f32 %v205_v24, %v170_v38 }
 0x107   :  { %181 = vst [vmem:[#allocation7 + $0x10] sm:$0xff] %v151_v39  ;;  %185 = vst [vmem:[#allocation7 + $0x30] sm:$0xff] %v171_v40 }
 0x108   :  { %362 = shalt.err (!%p359_p0)
}
 0x109   :  { %198 = dma.vmem_to_hbm [thread:$0]  %s193_s25, 1024, %s426_s3, [#allocation4], %s378_s15, %s378_s15, %s379_s16  }
 0x10a   :  { %375 = dma.done.wait [#allocation4], 1024  }
 0x10b   :  { %376 = vsyncadd [#allocation4], 4294966272 }
 0x10c   :  { %202 = vsyncpa [#allocation3], 1 }
 0x10d   :  { %203 = vsyncpa [#allocation6], 1 }
 0x10e   :  { %204 = vsyncpa [#allocation4], 1 }

</bundles_post_ra>
